<compile_context>
chip_gen: v7x
topology: tpu7x:2x2x1
jax: 0.10.0
libtpu: 0.0.40
codegen_flags: <defaults>
</compile_context>

<pallas_src>
import functools
import math

import jax
import jax.numpy as jnp
from jax.experimental import pallas as pl
from jax.experimental.pallas import tpu as pltpu

DECAY = 0.9          # fixed_decay_value (default config path)
RMS_EPS = 1e-8       # rms_norm_eps
_LANE = 128


def _round_up(x, m):
    return (x + m - 1) // m * m


def _packed_kernel(xh_ref, f_ref, wg_ref, gamma_ref, bg_ref, seg_ref, o_ref, *, inv_d):
    """d_head < 128 path: k = 128//d_head rows packed per 128-wide lane row."""
    x = xh_ref[...].astype(jnp.float32)        # (bm, 128)
    f = f_ref[...].astype(jnp.float32)         # (bm, 128)
    w = wg_ref[...].astype(jnp.float32)        # (1, 128) gate weight tiled across segments
    gamma = gamma_ref[...].astype(jnp.float32) # (1, 128) RMSNorm weight tiled across segments
    seg = seg_ref[...]                         # (128, 128) block-diag ones (segmented sum + bcast)
    b = bg_ref[0]                              # scalar gate bias (SMEM)

    # Gate: per-segment dot(x, w), broadcast back to each segment's lanes via the
    # block-diagonal matmul (MXU is idle in this mem-bound kernel, so this is ~free).
    logit = jnp.dot(x * w, seg, preferred_element_type=jnp.float32) + b
    gate = jax.nn.sigmoid(logit)

    # Decay + gate applied to the force.
    u = gate * (DECAY * f)

    # RMSNorm over each segment (original d_head); 1/D folded into the rsqrt.
    ss = jnp.dot(u * u, seg, preferred_element_type=jnp.float32)
    u = u * jax.lax.rsqrt(ss * inv_d + RMS_EPS) * gamma

    # Residual (lane-dense, unmasked full-tile store).
    o_ref[...] = (x + u).astype(o_ref.dtype)


def _wide_kernel(xh_ref, f_ref, wg_ref, gamma_ref, bg_ref, o_ref, *, inv_d):
    """d_head >= 128 path (lane axis zero-padded to a multiple of 128)."""
    x = xh_ref[...].astype(jnp.float32)
    f = f_ref[...].astype(jnp.float32)
    w = wg_ref[...].astype(jnp.float32)
    gamma = gamma_ref[...].astype(jnp.float32)
    b = bg_ref[0]

    logit = jnp.sum(x * w, axis=-1, keepdims=True) + b     # padded lanes: w = 0
    gate = jax.nn.sigmoid(logit)
    u = gate * (DECAY * f)
    ss = jnp.sum(u * u, axis=-1, keepdims=True)            # padded lanes: f = 0
    u = u * jax.lax.rsqrt(ss * inv_d + RMS_EPS) * gamma
    o_ref[...] = (x + u).astype(o_ref.dtype)


@functools.partial(jax.jit, static_argnames=("block_rows",))
def update_integrator(x_h, force, density_mod_factor, w_gate, b_gate, gamma,
                      *, block_rows=2048):
    """Pallas implementation of UpdateIntegrator.forward (default config, eval).

    x_h, force: (B, T, D); density_mod_factor: (B, T, 1) (unused under default config);
    w_gate: (1, D); b_gate: (1,); gamma: (1, D).
    Returns (x_out (B, T, D), aux_loss scalar 0.0).
    """
    del density_mod_factor  # 'decay' not in density_modulation_target (default config)
    B, T, D = x_h.shape
    rows = B * T
    out_dtype = x_h.dtype
    itemsize = jnp.dtype(out_dtype).itemsize
    sub = max(8, 32 // itemsize)  # min sublane tile (8 for f32, 16 for bf16)

    # Lane packing factor.
    if D < _LANE and _LANE % D == 0:
        k = _LANE // D
        L = _LANE
    else:
        k = 1
        L = _round_up(D, _LANE)

    # Row-tile size: as large as block_rows, shrunk for small inputs, and kept so the
    # grid has >=2 steps when possible (shards across v7x's two TensorCores).
    packed_rows_raw = -(-rows // k)
    bm = min(block_rows, _round_up(packed_rows_raw, sub))
    if packed_rows_raw >= 2 * sub:
        bm = min(bm, _round_up(-(-packed_rows_raw // 2), sub))
    bm = max(sub, _round_up(bm, sub))
    packed_rows = _round_up(packed_rows_raw, bm)
    rows_padded = packed_rows * k

    # Flatten (B, T, D) -> (rows, D), pad the ragged row tail with zeros.
    x2 = x_h.reshape(rows, D)
    f2 = force.reshape(rows, D)
    pad_r = rows_padded - rows
    if pad_r:
        x2 = jnp.pad(x2, ((0, pad_r), (0, 0)))
        f2 = jnp.pad(f2, ((0, pad_r), (0, 0)))

    w_row = w_gate.reshape(1, D).astype(jnp.float32)
    g_row = gamma.reshape(1, D).astype(jnp.float32)
    b_gate_f32 = b_gate.astype(jnp.float32)

    if k > 1:
        # Pack k consecutive rows per 128-lane row; tile per-feature params across segments.
        x2 = x2.reshape(packed_rows, L)
        f2 = f2.reshape(packed_rows, L)
        w_row = jnp.tile(w_row, (1, k))
        g_row = jnp.tile(g_row, (1, k))
        lane_seg = jnp.arange(L, dtype=jnp.int32) // D
        seg = (lane_seg[:, None] == lane_seg[None, :]).astype(jnp.float32)  # (L, L)
    else:
        pad_d = L - D
        if pad_d:
            x2 = jnp.pad(x2, ((0, 0), (0, pad_d)))
            f2 = jnp.pad(f2, ((0, 0), (0, pad_d)))
            w_row = jnp.pad(w_row, ((0, 0), (0, pad_d)))
            g_row = jnp.pad(g_row, ((0, 0), (0, pad_d)))

    grid = (packed_rows // bm,)
    row_spec = pl.BlockSpec((bm, L), lambda i: (i, 0))
    par_spec = pl.BlockSpec((1, L), lambda i: (0, 0))
    smem_spec = pl.BlockSpec(memory_space=pltpu.MemorySpace.SMEM)

    cost = pl.CostEstimate(
        flops=int(8 * rows_padded * D + (4 * packed_rows * L * L if k > 1 else 0)),
        transcendentals=int(2 * rows_padded),
        bytes_accessed=int(3 * packed_rows * L * itemsize),
    )
    # Double-buffered x/force/out streams + resident params/seg matrix + headroom;
    # capped at 64 MiB so a v6e-sized tile cannot blow v7x's smaller VMEM.
    vmem_limit = int(min(64 * 1024 * 1024,
                         max(16 * 1024 * 1024,
                             2 * 3 * bm * L * 4 + L * L * 4 + (4 << 20))))
    compiler_params = pltpu.CompilerParams(
        dimension_semantics=("parallel",),
        vmem_limit_bytes=vmem_limit,
    )

    if k > 1:
        kernel = functools.partial(_packed_kernel, inv_d=1.0 / D)
        in_specs = [row_spec, row_spec, par_spec, par_spec, smem_spec,
                    pl.BlockSpec((L, L), lambda i: (0, 0))]
        args = (x2, f2, w_row, g_row, b_gate_f32, seg)
    else:
        kernel = functools.partial(_wide_kernel, inv_d=1.0 / D)
        in_specs = [row_spec, row_spec, par_spec, par_spec, smem_spec]
        args = (x2, f2, w_row, g_row, b_gate_f32)

    out = pl.pallas_call(
        kernel,
        out_shape=jax.ShapeDtypeStruct((packed_rows, L), out_dtype),
        grid=grid,
        in_specs=in_specs,
        out_specs=row_spec,
        compiler_params=compiler_params,
        cost_estimate=cost,
        input_output_aliases={0: 0},   # write the residual in place of the packed x stream
    )(*args)

    if k > 1:
        out = out.reshape(rows_padded, D)
    else:
        out = out[:, :D]
    x_out = out[:rows].reshape(B, T, D)
    aux_loss = jnp.float32(0.0)
    return x_out, aux_loss


def _reference(x_h, force, w_gate, b_gate, gamma):
    gate = jax.nn.sigmoid(
        jnp.einsum("btd,od->bto", x_h, w_gate,
                   precision=jax.lax.Precision.HIGHEST) + b_gate)
    u = gate * (DECAY * force)
    ms = jnp.mean(u * u, axis=-1, keepdims=True)
    u = u * jax.lax.rsqrt(ms + RMS_EPS) * gamma
    return x_h + u


if __name__ == "__main__":
    B, T, D = 2, 8, 32

    key = jax.random.PRNGKey(0)
    k1, k2, k3, k4 = jax.random.split(key, 4)

    x_h = jax.random.normal(k1, (B, T, D), dtype=jnp.float32)
    force = jax.random.normal(k2, (B, T, D), dtype=jnp.float32)
    density = jnp.ones((B, T, 1), dtype=jnp.float32)

    bound = 1.0 / math.sqrt(D)
    w_gate = jax.random.uniform(k3, (1, D), minval=-bound, maxval=bound,
                                dtype=jnp.float32)   # Linear(D, 1).weight
    b_gate = jax.random.uniform(k4, (1,), minval=-bound, maxval=bound,
                                dtype=jnp.float32)   # Linear(D, 1).bias
    gamma = jnp.ones((1, D), dtype=jnp.float32)      # RMSNorm weight (init ones)

    x_out, aux = update_integrator(x_h, force, density, w_gate, b_gate, gamma)
    x_out = jax.block_until_ready(x_out)

    ref = _reference(x_h, force, w_gate, b_gate, gamma)
    assert x_out.shape == (B, T, D)
    max_err = float(jnp.max(jnp.abs(x_out - ref)))
    assert jnp.allclose(x_out, ref, atol=1e-4, rtol=1e-4), f"mismatch: max abs err {max_err}"
    assert float(aux) == 0.0

    print("KERNEL_OK")
</pallas_src>

<mosaic_0001>
module attributes {stable_mosaic.version = 11 : i64} {
  func.func @_packed_kernel(%arg0: i32, %arg1: memref<8x128xf32, #tpu.memory_space<vmem>>, %arg2: memref<8x128xf32, #tpu.memory_space<vmem>>, %arg3: memref<1x128xf32, #tpu.memory_space<vmem>>, %arg4: memref<1x128xf32, #tpu.memory_space<vmem>>, %arg5: memref<1xf32, #tpu.memory_space<smem>>, %arg6: memref<128x128xf32, #tpu.memory_space<vmem>>, %arg7: memref<8x128xf32, #tpu.memory_space<vmem>>) attributes {dimension_semantics = [#tpu.dimension_semantics<parallel>], iteration_bounds = array<i64: 1>, scalar_prefetch = 0 : i64, scratch_operands = 0 : i64, tpu.core_type = #tpu.core_type<tc>, window_params = [{transform_indices = @transform_0, window_bounds = array<i64: 8, 128>}, {transform_indices = @transform_1, window_bounds = array<i64: 8, 128>}, {pipeline_mode = #tpu.pipeline_mode<synchronous>, transform_indices = @transform_2, window_bounds = array<i64: 1, 128>}, {pipeline_mode = #tpu.pipeline_mode<synchronous>, transform_indices = @transform_3, window_bounds = array<i64: 1, 128>}, {transform_indices = @transform_4, window_bounds = array<i64: 1>}, {pipeline_mode = #tpu.pipeline_mode<synchronous>, transform_indices = @transform_5, window_bounds = array<i64: 128, 128>}, {transform_indices = @transform_6, window_bounds = array<i64: 8, 128>}]} {
    %c0 = arith.constant 0 : index
    %c0_0 = arith.constant 0 : index
    %0 = vector.load %arg1[%c0, %c0_0] : memref<8x128xf32, #tpu.memory_space<vmem>>, vector<8x128xf32>
    %c0_1 = arith.constant 0 : index
    %c0_2 = arith.constant 0 : index
    %1 = vector.load %arg2[%c0_1, %c0_2] : memref<8x128xf32, #tpu.memory_space<vmem>>, vector<8x128xf32>
    %c0_3 = arith.constant 0 : index
    %c0_4 = arith.constant 0 : index
    %2 = vector.load %arg3[%c0_3, %c0_4] : memref<1x128xf32, #tpu.memory_space<vmem>>, vector<1x128xf32>
    %c0_5 = arith.constant 0 : index
    %c0_6 = arith.constant 0 : index
    %3 = vector.load %arg4[%c0_5, %c0_6] : memref<1x128xf32, #tpu.memory_space<vmem>>, vector<1x128xf32>
    %c0_7 = arith.constant 0 : index
    %c0_8 = arith.constant 0 : index
    %4 = vector.load %arg6[%c0_7, %c0_8] : memref<128x128xf32, #tpu.memory_space<vmem>>, vector<128x128xf32>
    %c0_9 = arith.constant 0 : index
    %5 = memref.load %arg5[%c0_9] : memref<1xf32, #tpu.memory_space<smem>>
    %6 = vector.broadcast %2 : vector<1x128xf32> to vector<8x128xf32>
    %7 = arith.mulf %0, %6 : vector<8x128xf32>
    %cst = arith.constant dense<0.000000e+00> : vector<8x128xf32>
    %8 = tpu.matmul %7, %4, %cst {dimension_numbers = #tpu.dot_dimension_numbers<[1], [0], [0], [1], [0, 0, 1, 1], [], []>} : vector<8x128xf32>, vector<128x128xf32>, vector<8x128xf32> -> vector<8x128xf32>
    %9 = vector.broadcast %5 : f32 to vector<8x128xf32>
    %10 = arith.addf %8, %9 : vector<8x128xf32>
    %11 = arith.negf %10 : vector<8x128xf32>
    %12 = math.exp %11 : vector<8x128xf32>
    %cst_10 = arith.constant 1.000000e+00 : f32
    %13 = vector.broadcast %cst_10 : f32 to vector<8x128xf32>
    %14 = arith.addf %13, %12 : vector<8x128xf32>
    %15 = arith.divf %13, %14 : vector<8x128xf32>
    %cst_11 = arith.constant 0.899999976 : f32
    %16 = vector.broadcast %cst_11 : f32 to vector<8x128xf32>
    %17 = arith.mulf %16, %1 : vector<8x128xf32>
    %18 = arith.mulf %15, %17 : vector<8x128xf32>
    %19 = arith.mulf %18, %18 : vector<8x128xf32>
    %cst_12 = arith.constant dense<0.000000e+00> : vector<8x128xf32>
    %20 = tpu.matmul %19, %4, %cst_12 {dimension_numbers = #tpu.dot_dimension_numbers<[1], [0], [0], [1], [0, 0, 1, 1], [], []>} : vector<8x128xf32>, vector<128x128xf32>, vector<8x128xf32> -> vector<8x128xf32>
    %cst_13 = arith.constant 3.125000e-02 : f32
    %21 = vector.broadcast %cst_13 : f32 to vector<8x128xf32>
    %22 = arith.mulf %20, %21 : vector<8x128xf32>
    %cst_14 = arith.constant 9.99999993E-9 : f32
    %23 = vector.broadcast %cst_14 : f32 to vector<8x128xf32>
    %24 = arith.addf %22, %23 : vector<8x128xf32>
    %25 = math.rsqrt %24 : vector<8x128xf32>
    %26 = arith.mulf %18, %25 : vector<8x128xf32>
    %27 = vector.broadcast %3 : vector<1x128xf32> to vector<8x128xf32>
    %28 = arith.mulf %26, %27 : vector<8x128xf32>
    %29 = arith.addf %0, %28 : vector<8x128xf32>
    %c0_15 = arith.constant 0 : index
    %c0_16 = arith.constant 0 : index
    %30 = vector.load %arg7[%c0_15, %c0_16] : memref<8x128xf32, #tpu.memory_space<vmem>>, vector<8x128xf32>
    tpu.vector_store %arg7[%c0_15, %c0_16], %29 {strides = array<i32>} : memref<8x128xf32, #tpu.memory_space<vmem>>, vector<8x128xf32>,
    return
  }
  func.func @transform_0(%arg0: i32) -> (i32, i32) {
    %c0_i32 = arith.constant 0 : i32
    %c0_i32_0 = arith.constant 0 : i32
    return %arg0, %c0_i32 : i32, i32
  }
  func.func @transform_1(%arg0: i32) -> (i32, i32) {
    %c0_i32 = arith.constant 0 : i32
    %c0_i32_0 = arith.constant 0 : i32
    return %arg0, %c0_i32 : i32, i32
  }
  func.func @transform_2(%arg0: i32) -> (i32, i32) {
    %c0_i32 = arith.constant 0 : i32
    %c0_i32_0 = arith.constant 0 : i32
    %c0_i32_1 = arith.constant 0 : i32
    return %c0_i32, %c0_i32_0 : i32, i32
  }
  func.func @transform_3(%arg0: i32) -> (i32, i32) {
    %c0_i32 = arith.constant 0 : i32
    %c0_i32_0 = arith.constant 0 : i32
    %c0_i32_1 = arith.constant 0 : i32
    return %c0_i32, %c0_i32_0 : i32, i32
  }
  func.func @transform_4(%arg0: i32) -> i32 {
    %c0_i32 = arith.constant 0 : i32
    %c0_i32_0 = arith.constant 0 : i32
    return %c0_i32 : i32
  }
  func.func @transform_5(%arg0: i32) -> (i32, i32) {
    %c0_i32 = arith.constant 0 : i32
    %c0_i32_0 = arith.constant 0 : i32
    %c0_i32_1 = arith.constant 0 : i32
    return %c0_i32, %c0_i32_0 : i32, i32
  }
  func.func @transform_6(%arg0: i32) -> (i32, i32) {
    %c0_i32 = arith.constant 0 : i32
    %c0_i32_0 = arith.constant 0 : i32
    return %arg0, %c0_i32 : i32, i32
  }
}

</mosaic_0001>

<bundles_post_ra>
// kernel: update_integrator.1
= control target key start
LH: loop header
LB: loop body
LE: loop exit
PB: predicated region body
PF: predicated region fallthrough
CT: control target
= control target key end

     0   :  { %v383_v0 = vmov 0.0|0.0   ;;  %vm384_vm0 = vmmov 0   ;;  %v385_v4 = vmov 0.0   ;;  %s487_s5 = inlined_call_operand.vmem [shape: f32[128,128], index: 5, kind: input, shape index: {}]   ;;  %s488_s0 = inlined_call_operand.vmem [shape: f32[8,128], index: 0, kind: input, shape index: {}, may-alias: {0,6}]   ;;  %s489_s2 = inlined_call_operand.vmem [shape: f32[1,128], index: 2, kind: input, shape index: {}]   ;;  %s490_s4 = inlined_call_operand.<no memory space> [shape: f32[1], index: 4, kind: input, shape index: {}]   ;;  %s491_s1 = inlined_call_operand.vmem [shape: f32[8,128], index: 1, kind: input, shape index: {}]   ;;  %s492_s3 = inlined_call_operand.vmem [shape: f32[1,128], index: 3, kind: input, shape index: {}]   ;;  %s493_s6 = inlined_call_operand.vmem [shape: f32[8,128], index: 6, kind: output, shape index: {}, may-alias: {0,6}]  }
   0x1   :  { %326 = vmatprep.subr.bf16.mxu0 %v383_v0  ;;  %v28_v1 = vld [vmem:[%s487_s5] sm:$0xff]  ;;  %v29_v2 = vld [vmem:[%s487_s5 + $0x8] sm:$0xff]  ;;  %v30_v3 = vld [vmem:[%s487_s5 + $0x10] sm:$0xff]  ;;  %288 = vmatprep.mubr.msk.f32.mxu0 %vm384_vm0, %v385_v4  ;;  %v52_v29 = vstv %s490_s4 }
   0x2   :  { %v327_v5 = vpack.c.bf16 %v29_v2, %v28_v1  ;;  %v31_v6 = vld [vmem:[%s487_s5 + $0x18] sm:$0xff]  ;;  %350 = vmatprep.subr.bf16.mxu1 %v383_v0  ;;  %323 = vmatprep.mubr.msk.f32.mxu1 %vm384_vm0, %v385_v4  ;;  %v32_v8 = vld [vmem:[%s487_s5 + $0x20] sm:$0xff]  ;;  %v33_v9 = vld [vmem:[%s487_s5 + $0x28] sm:$0xff] }
   0x3   :  { %v330_v7 = vpack.c.bf16 %v31_v6, %v30_v3  ;;  %v333_v10 = vpack.c.bf16 %v33_v9, %v32_v8  ;;  %v34_v11 = vld [vmem:[%s487_s5 + $0x30] sm:$0xff]  ;;  %v35_v12 = vld [vmem:[%s487_s5 + $0x38] sm:$0xff]  ;;  %v36_v14 = vld [vmem:[%s487_s5 + $0x40] sm:$0xff] }
   0x4   :  { %328 = vmatpush3.bf16.msra.mxu0 %v327_v5  ;;  %352 = vmatpush3.bf16.msra.mxu1 %v327_v5  ;;  %v336_v13 = vpack.c.bf16 %v35_v12, %v34_v11  ;;  %v37_v15 = vld [vmem:[%s487_s5 + $0x48] sm:$0xff]  ;;  %v38_v17 = vld [vmem:[%s487_s5 + $0x50] sm:$0xff]  ;;  %v39_v18 = vld [vmem:[%s487_s5 + $0x58] sm:$0xff] }
   0x5   :  { %329 = vmatprep.subr.bf16.mxu0 %v383_v0  ;;  %353 = vmatprep.subr.bf16.mxu1 %v383_v0  ;;  %v339_v16 = vpack.c.bf16 %v37_v15, %v36_v14  ;;  %v342_v19 = vpack.c.bf16 %v39_v18, %v38_v17  ;;  %v40_v20 = vld [vmem:[%s487_s5 + $0x60] sm:$0xff]  ;;  %v41_v21 = vld [vmem:[%s487_s5 + $0x68] sm:$0xff]  ;;  %v42_v23 = vld [vmem:[%s487_s5 + $0x70] sm:$0xff] }
   0x6   :  { %v345_v22 = vpack.c.bf16 %v41_v21, %v40_v20  ;;  %v43_v24 = vld [vmem:[%s487_s5 + $0x78] sm:$0xff]  ;;  %v24_v26 = vld [vmem:[%s488_s0] sm:$0xff] }
   0x7   :  { %v348_v25 = vpack.c.bf16 %v43_v24, %v42_v23  ;;  %v219_v27 = vld [vmem:[%s489_s2] ss:$0 sm:$0xff] }
   0x8   :  { %331 = vmatpush3.bf16.msra.mxu0 %v330_v7  ;;  %355 = vmatpush3.bf16.msra.mxu1 %v330_v7  ;;  %v51_v28 = vmul.f32 %v219_v27, %v24_v26  ;;  %v25_v36 = vld [vmem:[%s491_s1] sm:$0xff] }
   0x9   :  { %332 = vmatprep.subr.bf16.mxu0 %v383_v0  ;;  %356 = vmatprep.subr.bf16.mxu1 %v383_v0  ;;  %v129_v37 = vmul.f32 0.9, %v25_v36  ;;  %v221_v46 = vld [vmem:[%s492_s3] ss:$0 sm:$0xff] }
   0xc   :  { %334 = vmatpush3.bf16.msra.mxu0 %v333_v10  ;;  %358 = vmatpush3.bf16.msra.mxu1 %v333_v10 }
   0xd   :  { %335 = vmatprep.subr.bf16.mxu0 %v383_v0  ;;  %359 = vmatprep.subr.bf16.mxu1 %v383_v0 }
  0x10   :  { %337 = vmatpush3.bf16.msra.mxu0 %v336_v13  ;;  %361 = vmatpush3.bf16.msra.mxu1 %v336_v13 }
  0x11   :  { %338 = vmatprep.subr.bf16.mxu0 %v383_v0  ;;  %362 = vmatprep.subr.bf16.mxu1 %v383_v0 }
  0x14   :  { %340 = vmatpush3.bf16.msra.mxu0 %v339_v16  ;;  %364 = vmatpush3.bf16.msra.mxu1 %v339_v16 }
  0x15   :  { %341 = vmatprep.subr.bf16.mxu0 %v383_v0  ;;  %365 = vmatprep.subr.bf16.mxu1 %v383_v0 }
  0x18   :  { %343 = vmatpush3.bf16.msra.mxu0 %v342_v19  ;;  %367 = vmatpush3.bf16.msra.mxu1 %v342_v19 }
  0x19   :  { %344 = vmatprep.subr.bf16.mxu0 %v383_v0  ;;  %368 = vmatprep.subr.bf16.mxu1 %v383_v0 }
  0x1c   :  { %346 = vmatpush3.bf16.msra.mxu0 %v345_v22  ;;  %370 = vmatpush3.bf16.msra.mxu1 %v345_v22 }
  0x1d   :  { %347 = vmatprep.subr.bf16.mxu0 %v383_v0  ;;  %371 = vmatprep.subr.bf16.mxu1 %v383_v0 }
  0x20   :  { %349 = vmatpush3.bf16.msra.mxu0 %v348_v25  ;;  %373 = vmatpush3.bf16.msra.mxu1 %v348_v25 }
  0x23   :  { %289 = vmatmul.mubr.f32.vlgmr.msra.gmra.mrb[0].mxu0 %v51_v28 }
  0xf6   :  { %v119_v30 = vpop.f32.mrb[0].mxu0 }
  0xf7   :  { %v120_v31 = vadd.f32 %v119_v30, %v52_v29  ;;  %v290_v32 = vpop.f32.mrb[1].mxu0 }
  0xf9   :  { %v220_v33 = vmul.f32 -1.442695, %v120_v31 }
  0xfb   :  { %377 = vpow2.f32 %v220_v33 }
 0x105   :  { %v378_v34 = vpop.eup %377 }
 0x106   :  { %v126_v35 = vadd.f32 1.0, %v378_v34 }
 0x108   :  { %379 = vrcp.f32 %v126_v35 }
 0x112   :  { %v380_v38 = vpop.eup %379 }
 0x113   :  { %v130_v39 = vmul.f32 %v380_v38, %v129_v37 }
 0x115   :  { %v131_v40 = vmul.f32 %v130_v39, %v130_v39 }
 0x117   :  { %324 = vmatmul.mubr.f32.vlgmr.msra.gmra.mrb[0].mxu1 %v131_v40 }
 0x1ea   :  { %v198_v41 = vpop.f32.mrb[0].mxu1 }
 0x1eb   :  { %v202_v42 = vmul.f32 0.03125, %v198_v41  ;;  %v325_v43 = vpop.f32.mrb[1].mxu1 }
 0x1ed   :  { %v203_v44 = vadd.f32 1e-08, %v202_v42 }
 0x1ef   :  { %381 = vrsqrt.f32 %v203_v44 }
 0x1f9   :  { %v382_v45 = vpop.eup %381 }
 0x1fa   :  { %v205_v47 = vmul.f32 %v382_v45, %v130_v39 }
 0x1fc   :  { %v212_v48 = vmul.f32 %v221_v46, %v205_v47 }
 0x1fe   :  { %v213_v49 = vadd.f32 %v212_v48, %v24_v26 }
 0x200   :  { %214 = vst [vmem:[%s493_s6] sm:$0xff] %v213_v49 }

</bundles_post_ra>
